<compile_context>
chip_gen: v6e
topology: v6e:2x2x1
jax: 0.10.0
libtpu: 0.0.40
codegen_flags: <defaults>
</compile_context>

<pallas_src>
import functools

import jax
import jax.numpy as jnp
from jax.experimental import pallas as pl
from jax.experimental.pallas import tpu as pltpu

H1 = 128          # first hidden width (already lane-dense)
H2 = 64           # second hidden width (padded to LANE for the middle matmul)
LANE = 128


def _mlp_kernel(x_ref, w1_ref, b1_ref, w2_ref, b2_ref, w3_ref, b3_ref, o_ref):
    # One (TB, in_c) batch tile -> (TB, out_c) Q-values.
    # Matmul inputs bf16 (MXU native); accumulation, bias-add and ReLU in f32.
    x = x_ref[...].astype(jnp.bfloat16)                                   # [TB, in_c]
    h1 = jnp.dot(x, w1_ref[...], preferred_element_type=jnp.float32) + b1_ref[...]
    h1 = jnp.maximum(h1, 0.0).astype(jnp.bfloat16)                        # [TB, 128]
    h2 = jnp.dot(h1, w2_ref[...], preferred_element_type=jnp.float32) + b2_ref[...]
    h2 = jnp.maximum(h2, 0.0).astype(jnp.bfloat16)                        # [TB, 128] (cols >= H2 are 0)
    out = jnp.dot(h2, w3_ref[...], preferred_element_type=jnp.float32) + b3_ref[...]
    o_ref[...] = out                                                      # [TB, out_c] f32 (masked lanes)


def _prep_params(params):
    """Cast weights to bf16; zero-pad only where needed for lane-dense hidden matmuls.

    Padding is mathematically inert: padded hidden columns see zero weight and zero
    bias (ReLU(0)=0), and the matching w3 rows are zero.
    """
    out_c = params["w3"].shape[1]
    w1 = params["w1"].astype(jnp.bfloat16)                                # [in_c, 128]
    b1 = params["b1"].astype(jnp.float32).reshape(1, H1)                  # [1, 128]
    w2 = jnp.zeros((H1, LANE), jnp.bfloat16).at[:, :H2].set(
        params["w2"].astype(jnp.bfloat16))                                # [128, 128]
    b2 = jnp.zeros((1, LANE), jnp.float32).at[:, :H2].set(
        params["b2"].astype(jnp.float32))                                 # [1, 128]
    w3 = jnp.zeros((LANE, out_c), jnp.bfloat16).at[:H2, :].set(
        params["w3"].astype(jnp.bfloat16))                                # [128, out_c]
    b3 = params["b3"].astype(jnp.float32).reshape(1, out_c)               # [1, out_c]
    return w1, b1, w2, b2, w3, b3, out_c


def _round_up(n, m):
    return ((n + m - 1) // m) * m


@functools.partial(jax.jit, static_argnames=("tb",))
def net_forward(x, params, tb=2048):
    """x: [B, in_c] float32; params: dict of w1,b1,w2,b2,w3,b3 (weights stored [in, out]).

    Returns [B, out_c] float32 Q-values (same semantics as Net.forward).
    """
    B, in_c = x.shape
    w1, b1, w2, b2, w3, b3, out_c = _prep_params(params)

    # Batch tile: big enough to amortize the ~0.35us/grid-step overhead, never
    # larger than the sublane-rounded batch (avoids useless tail padding).
    tb_eff = max(8, min(tb, _round_up(B, 8)))
    # v7x megacore: keep >=2 grid steps for large batches so the "parallel" batch
    # axis actually shards across both TensorCores.
    if B > 1024 and pl.cdiv(B, tb_eff) < 2:
        tb_eff = _round_up(pl.cdiv(B, 2), 8)
    grid = (pl.cdiv(B, tb_eff),)

    resident = lambda i: (0, 0)   # constant block index -> weights stay VMEM-resident
    # TODO(synk): a pl.Buffered(1) pipeline_mode on the resident operands would drop
    # their dead second pipeline buffer (~66 KiB); skipped as a negligible win.

    out = pl.pallas_call(
        _mlp_kernel,
        out_shape=jax.ShapeDtypeStruct((B, out_c), jnp.float32),
        grid=grid,
        in_specs=[
            pl.BlockSpec((tb_eff, in_c), lambda i: (i, 0)),   # streamed batch tile (f32)
            pl.BlockSpec((in_c, LANE), resident),             # w1
            pl.BlockSpec((1, LANE), resident),                # b1
            pl.BlockSpec((H1, LANE), resident),               # w2 (cols padded to 128)
            pl.BlockSpec((1, LANE), resident),                # b2 (padded)
            pl.BlockSpec((LANE, out_c), resident),            # w3 (rows padded to 128)
            pl.BlockSpec((1, out_c), resident),               # b3
        ],
        out_specs=pl.BlockSpec((tb_eff, out_c), lambda i: (i, 0)),  # lane-sparse, tiny bytes
        compiler_params=pltpu.CompilerParams(
            dimension_semantics=("parallel",),
            vmem_limit_bytes=32 * 1024 * 1024),  # covers v5e's 16 MiB default scoped VMEM
    )(x, w1, b1, w2, b2, w3, b3)

    return out
    # TODO(synk): for the real DQN act() path (B~1-32) fuse online+target forwards and
    # the action argmax into one pallas_call (output (B,1) int32) to kill the per-step
    # dispatch overhead; kept separate here to preserve Net.forward semantics.


def init_params(key, in_c, out_c):
    """Deterministic synthetic init matching the PyTorch module's shapes.

    Hidden layers: weight ~ N(0, 0.1) (as in the module); bias = PyTorch default
    uniform(-1/sqrt(fan_in), 1/sqrt(fan_in)). Output layer: PyTorch default init.
    Weights are stored transposed, i.e. [in, out].
    """
    ks = jax.random.split(key, 6)

    def uniform(k, shape, fan_in):
        bound = 1.0 / jnp.sqrt(jnp.float32(fan_in))
        return jax.random.uniform(k, shape, jnp.float32, -bound, bound)

    w1 = 0.1 * jax.random.normal(ks[0], (in_c, H1), jnp.float32)
    b1 = uniform(ks[1], (1, H1), in_c)
    w2 = 0.1 * jax.random.normal(ks[2], (H1, H2), jnp.float32)
    b2 = uniform(ks[3], (1, H2), H1)
    w3 = uniform(ks[4], (H2, out_c), H2)
    b3 = uniform(ks[5], (1, out_c), H2)
    return {"w1": w1, "b1": b1, "w2": w2, "b2": b2, "w3": w3, "b3": b3}


def net_forward_ref(x, p):
    h1 = jnp.maximum(x @ p["w1"] + p["b1"], 0.0)
    h2 = jnp.maximum(h1 @ p["w2"] + p["b2"], 0.0)
    return h2 @ p["w3"] + p["b3"]


if __name__ == "__main__":
    key = jax.random.PRNGKey(0)
    k_x, k_p, k_x2 = jax.random.split(key, 3)

    in_c, out_c = 4, 2  # CartPole-like: state dim 4, 2 actions
    params = init_params(k_p, in_c, out_c)

    # act()-sized batch: single grid step.
    x = jax.random.normal(k_x, (8, in_c), jnp.float32)
    out = jax.block_until_ready(net_forward(x, params))
    ref = net_forward_ref(x, params)
    assert out.shape == (8, out_c)
    # bf16 matmul inputs (f32 accumulation) -> loosened tolerance vs f32 reference.
    assert jnp.allclose(out, ref, atol=2e-2, rtol=2e-2), "mismatch vs reference (B=8)"

    # Ragged multi-step batch: exercises the masked tail store (20 = 2*8 + 4).
    x2 = jax.random.normal(k_x2, (20, in_c), jnp.float32)
    out2 = jax.block_until_ready(net_forward(x2, params, tb=8))
    ref2 = net_forward_ref(x2, params)
    assert out2.shape == (20, out_c)
    assert jnp.allclose(out2, ref2, atol=2e-2, rtol=2e-2), "mismatch vs reference (B=20)"

    print("KERNEL_OK")
</pallas_src>

<mosaic_0001>
module attributes {stable_mosaic.version = 11 : i64} {
  func.func @_mlp_kernel(%arg0: i32, %arg1: memref<8x4xf32, #tpu.memory_space<vmem>>, %arg2: memref<4x128xbf16, #tpu.memory_space<vmem>>, %arg3: memref<1x128xf32, #tpu.memory_space<vmem>>, %arg4: memref<128x128xbf16, #tpu.memory_space<vmem>>, %arg5: memref<1x128xf32, #tpu.memory_space<vmem>>, %arg6: memref<128x2xbf16, #tpu.memory_space<vmem>>, %arg7: memref<1x2xf32, #tpu.memory_space<vmem>>, %arg8: memref<8x2xf32, #tpu.memory_space<vmem>>) attributes {dimension_semantics = [#tpu.dimension_semantics<parallel>], iteration_bounds = array<i64: 1>, scalar_prefetch = 0 : i64, scratch_operands = 0 : i64, tpu.core_type = #tpu.core_type<tc>, window_params = [{transform_indices = @transform_0, window_bounds = array<i64: 8, 4>}, {pipeline_mode = #tpu.pipeline_mode<synchronous>, transform_indices = @transform_1, window_bounds = array<i64: 4, 128>}, {pipeline_mode = #tpu.pipeline_mode<synchronous>, transform_indices = @transform_2, window_bounds = array<i64: 1, 128>}, {pipeline_mode = #tpu.pipeline_mode<synchronous>, transform_indices = @transform_3, window_bounds = array<i64: 128, 128>}, {pipeline_mode = #tpu.pipeline_mode<synchronous>, transform_indices = @transform_4, window_bounds = array<i64: 1, 128>}, {pipeline_mode = #tpu.pipeline_mode<synchronous>, transform_indices = @transform_5, window_bounds = array<i64: 128, 2>}, {pipeline_mode = #tpu.pipeline_mode<synchronous>, transform_indices = @transform_6, window_bounds = array<i64: 1, 2>}, {transform_indices = @transform_7, window_bounds = array<i64: 8, 2>}]} {
    %c0 = arith.constant 0 : index
    %c0_0 = arith.constant 0 : index
    %0 = vector.load %arg1[%c0, %c0_0] : memref<8x4xf32, #tpu.memory_space<vmem>>, vector<8x4xf32>
    %1 = arith.truncf %0 : vector<8x4xf32> to vector<8x4xbf16>
    %c0_1 = arith.constant 0 : index
    %c0_2 = arith.constant 0 : index
    %2 = vector.load %arg2[%c0_1, %c0_2] : memref<4x128xbf16, #tpu.memory_space<vmem>>, vector<4x128xbf16>
    %cst = arith.constant dense<0.000000e+00> : vector<8x128xf32>
    %3 = tpu.matmul %1, %2, %cst {dimension_numbers = #tpu.dot_dimension_numbers<[1], [0], [0], [1], [0, 0, 1, 1], [], []>} : vector<8x4xbf16>, vector<4x128xbf16>, vector<8x128xf32> -> vector<8x128xf32>
    %c0_3 = arith.constant 0 : index
    %c0_4 = arith.constant 0 : index
    %4 = vector.load %arg3[%c0_3, %c0_4] : memref<1x128xf32, #tpu.memory_space<vmem>>, vector<1x128xf32>
    %5 = vector.broadcast %4 : vector<1x128xf32> to vector<8x128xf32>
    %6 = arith.addf %3, %5 : vector<8x128xf32>
    %cst_5 = arith.constant 0.000000e+00 : f32
    %7 = vector.broadcast %cst_5 : f32 to vector<8x128xf32>
    %8 = arith.maximumf %6, %7 : vector<8x128xf32>
    %9 = arith.truncf %8 : vector<8x128xf32> to vector<8x128xbf16>
    %c0_6 = arith.constant 0 : index
    %c0_7 = arith.constant 0 : index
    %10 = vector.load %arg4[%c0_6, %c0_7] : memref<128x128xbf16, #tpu.memory_space<vmem>>, vector<128x128xbf16>
    %cst_8 = arith.constant dense<0.000000e+00> : vector<8x128xf32>
    %11 = tpu.matmul %9, %10, %cst_8 {dimension_numbers = #tpu.dot_dimension_numbers<[1], [0], [0], [1], [0, 0, 1, 1], [], []>} : vector<8x128xbf16>, vector<128x128xbf16>, vector<8x128xf32> -> vector<8x128xf32>
    %c0_9 = arith.constant 0 : index
    %c0_10 = arith.constant 0 : index
    %12 = vector.load %arg5[%c0_9, %c0_10] : memref<1x128xf32, #tpu.memory_space<vmem>>, vector<1x128xf32>
    %13 = vector.broadcast %12 : vector<1x128xf32> to vector<8x128xf32>
    %14 = arith.addf %11, %13 : vector<8x128xf32>
    %cst_11 = arith.constant 0.000000e+00 : f32
    %15 = vector.broadcast %cst_11 : f32 to vector<8x128xf32>
    %16 = arith.maximumf %14, %15 : vector<8x128xf32>
    %17 = arith.truncf %16 : vector<8x128xf32> to vector<8x128xbf16>
    %c0_12 = arith.constant 0 : index
    %c0_13 = arith.constant 0 : index
    %18 = vector.load %arg6[%c0_12, %c0_13] : memref<128x2xbf16, #tpu.memory_space<vmem>>, vector<128x2xbf16>
    %cst_14 = arith.constant dense<0.000000e+00> : vector<8x2xf32>
    %19 = tpu.matmul %17, %18, %cst_14 {dimension_numbers = #tpu.dot_dimension_numbers<[1], [0], [0], [1], [0, 0, 1, 1], [], []>} : vector<8x128xbf16>, vector<128x2xbf16>, vector<8x2xf32> -> vector<8x2xf32>
    %c0_15 = arith.constant 0 : index
    %c0_16 = arith.constant 0 : index
    %20 = vector.load %arg7[%c0_15, %c0_16] : memref<1x2xf32, #tpu.memory_space<vmem>>, vector<1x2xf32>
    %21 = vector.broadcast %20 : vector<1x2xf32> to vector<8x2xf32>
    %22 = arith.addf %19, %21 : vector<8x2xf32>
    %c0_17 = arith.constant 0 : index
    %c0_18 = arith.constant 0 : index
    %23 = vector.load %arg8[%c0_17, %c0_18] : memref<8x2xf32, #tpu.memory_space<vmem>>, vector<8x2xf32>
    tpu.vector_store %arg8[%c0_17, %c0_18], %22 {strides = array<i32>} : memref<8x2xf32, #tpu.memory_space<vmem>>, vector<8x2xf32>,
    return
  }
  func.func @transform_0(%arg0: i32) -> (i32, i32) {
    %c0_i32 = arith.constant 0 : i32
    %c0_i32_0 = arith.constant 0 : i32
    return %arg0, %c0_i32 : i32, i32
  }
  func.func @transform_1(%arg0: i32) -> (i32, i32) {
    %c0_i32 = arith.constant 0 : i32
    %c0_i32_0 = arith.constant 0 : i32
    %c0_i32_1 = arith.constant 0 : i32
    return %c0_i32, %c0_i32_0 : i32, i32
  }
  func.func @transform_2(%arg0: i32) -> (i32, i32) {
    %c0_i32 = arith.constant 0 : i32
    %c0_i32_0 = arith.constant 0 : i32
    %c0_i32_1 = arith.constant 0 : i32
    return %c0_i32, %c0_i32_0 : i32, i32
  }
  func.func @transform_3(%arg0: i32) -> (i32, i32) {
    %c0_i32 = arith.constant 0 : i32
    %c0_i32_0 = arith.constant 0 : i32
    %c0_i32_1 = arith.constant 0 : i32
    return %c0_i32, %c0_i32_0 : i32, i32
  }
  func.func @transform_4(%arg0: i32) -> (i32, i32) {
    %c0_i32 = arith.constant 0 : i32
    %c0_i32_0 = arith.constant 0 : i32
    %c0_i32_1 = arith.constant 0 : i32
    return %c0_i32, %c0_i32_0 : i32, i32
  }
  func.func @transform_5(%arg0: i32) -> (i32, i32) {
    %c0_i32 = arith.constant 0 : i32
    %c0_i32_0 = arith.constant 0 : i32
    %c0_i32_1 = arith.constant 0 : i32
    return %c0_i32, %c0_i32_0 : i32, i32
  }
  func.func @transform_6(%arg0: i32) -> (i32, i32) {
    %c0_i32 = arith.constant 0 : i32
    %c0_i32_0 = arith.constant 0 : i32
    %c0_i32_1 = arith.constant 0 : i32
    return %c0_i32, %c0_i32_0 : i32, i32
  }
  func.func @transform_7(%arg0: i32) -> (i32, i32) {
    %c0_i32 = arith.constant 0 : i32
    %c0_i32_0 = arith.constant 0 : i32
    return %arg0, %c0_i32 : i32, i32
  }
}

</mosaic_0001>

<bundles_post_ra>
// kernel: net_forward.1
= control target key start
LH: loop header
LB: loop body
LE: loop exit
PB: predicated region body
PF: predicated region fallthrough
CT: control target
= control target key end

     0   :  { %vm41_vm0 = vcmask 1041408   ;;  %v421_v0 = vmov 0.0   ;;  %vm422_vm1 = vmmov 0   ;;  %vm37_vm2 = vcmask 31744   ;;  %s552_s1 = inlined_call_operand.vmem [shape: bf16[4,128], index: 1, kind: input, shape index: {}]   ;;  %s553_s0 = inlined_call_operand.vmem [shape: f32[8,4], index: 0, kind: input, shape index: {}]   ;;  %s554_s3 = inlined_call_operand.vmem [shape: bf16[128,128], index: 3, kind: input, shape index: {}]   ;;  %s555_s5 = inlined_call_operand.vmem [shape: bf16[128,2], index: 5, kind: input, shape index: {}]   ;;  %s556_s2 = inlined_call_operand.vmem [shape: f32[1,128], index: 2, kind: input, shape index: {}]   ;;  %s557_s4 = inlined_call_operand.vmem [shape: f32[1,128], index: 4, kind: input, shape index: {}]   ;;  %s558_s6 = inlined_call_operand.vmem [shape: f32[1,2], index: 6, kind: input, shape index: {}]   ;;  %s559_s7 = inlined_call_operand.vmem [shape: f32[8,2], index: 7, kind: output, shape index: {}]  }
   0x1   :  { %357 = vmatprep.subr.bf16.mxu0 %v421_v0  ;;  %v29_v1 = vld [vmem:[%s552_s1] sm:$0x3]  ;;  %359 = vmatprep.mubr.msk.bf16.mxu0 %vm422_vm1, %v421_v0  ;;  %v405_v5 = vld [vmem:[%s554_s3 + $0x38] sm:$0xff]   ;;  %v406_v6 = vld [vmem:[%s554_s3 + $0x30] sm:$0xff]   ;;  %vm311_vm3 = vcmask 15360  }
   0x2   :  { %v27_v2 = vld [vmem:[%s553_s0] sm:$0xff]  ;;  %v43_v3 = vsel %vm41_vm0, %v29_v1, 0  ;;  %363 = vmatprep.subr.bf16.mxu1 %v421_v0  ;;  %379 = vmatprep.mubr.msk.bf16.mxu1 %vm422_vm1, %v421_v0  ;;  %v407_v7 = vld [vmem:[%s554_s3 + $0x28] sm:$0xff]   ;;  %v409_v9 = vld [vmem:[%s554_s3 + $0x18] sm:$0xff]  }
   0x3   :  { %v28_v4 = vpack.c.bf16 %v27_v2, %v27_v2  ;;  %358 = vmatpush3.bf16.msra.mxu0 %v43_v3  ;;  %364 = vmatpush3.bf16.msra.mxu1 %v405_v5  ;;  %v408_v8 = vld [vmem:[%s554_s3 + $0x20] sm:$0xff]   ;;  %v410_v10 = vld [vmem:[%s554_s3 + $0x10] sm:$0xff]   ;;  %v411_v11 = vld [vmem:[%s554_s3 + $0x8] sm:$0xff]  }
   0x4   :  { %383 = vmatprep.subr.bf16.mxu0 %v421_v0  ;;  %365 = vmatprep.subr.bf16.mxu1 %v421_v0  ;;  %v412_v12 = vld [vmem:[%s554_s3] sm:$0xff]   ;;  %v413_v13 = vld [vmem:[%s555_s5 + $0x38] sm:$0xff]   ;;  %v414_v14 = vld [vmem:[%s555_s5 + $0x30] sm:$0xff]  }
   0x5   :  { %v415_v15 = vld [vmem:[%s555_s5 + $0x28] sm:$0xff]   ;;  %v416_v16 = vld [vmem:[%s555_s5 + $0x20] sm:$0xff]   ;;  %v417_v17 = vld [vmem:[%s555_s5 + $0x18] sm:$0xff]  }
   0x6   :  { %360 = vmatmul.mubr.msk.bf16.vlgmr.msra.gmra.mxu0 %vm37_vm2, %v28_v4  ;;  %v418_v18 = vld [vmem:[%s555_s5 + $0x10] sm:$0xff]   ;;  %v317_v19 = vld [vmem:[%s556_s2] ss:$0 sm:$0xff]  ;;  %v419_v27 = vld [vmem:[%s555_s5 + $0x8] sm:$0xff]  }
   0x7   :  { %399 = vmatprep.mubr.msk.bf16.mxu0 %vm422_vm1, %v421_v0  ;;  %366 = vmatpush3.bf16.msra.mxu1 %v406_v6  ;;  %v420_v28 = vld [vmem:[%s555_s5] sm:$0xff]  }
   0x8   :  { %367 = vmatprep.subr.bf16.mxu1 %v421_v0  ;;  %384 = vmatpush3.bf16.msra.mxu0 %v413_v13  ;;  %v319_v29 = vld [vmem:[%s557_s4] ss:$0 sm:$0xff] }
   0x9   :  { %385 = vmatprep.subr.bf16.mxu0 %v421_v0  ;;  %v328_v37 = vld [vmem:[%s558_s6] ss:$0 sm:$0xff] }
   0xb   :  { %368 = vmatpush3.bf16.msra.mxu1 %v407_v7 }
   0xc   :  { %369 = vmatprep.subr.bf16.mxu1 %v421_v0  ;;  %386 = vmatpush3.bf16.msra.mxu0 %v414_v14 }
   0xd   :  { %387 = vmatprep.subr.bf16.mxu0 %v421_v0 }
   0xf   :  { %370 = vmatpush3.bf16.msra.mxu1 %v408_v8 }
  0x10   :  { %371 = vmatprep.subr.bf16.mxu1 %v421_v0  ;;  %388 = vmatpush3.bf16.msra.mxu0 %v415_v15 }
  0x11   :  { %389 = vmatprep.subr.bf16.mxu0 %v421_v0 }
  0x13   :  { %372 = vmatpush3.bf16.msra.mxu1 %v409_v9 }
  0x14   :  { %373 = vmatprep.subr.bf16.mxu1 %v421_v0  ;;  %390 = vmatpush3.bf16.msra.mxu0 %v416_v16 }
  0x15   :  { %391 = vmatprep.subr.bf16.mxu0 %v421_v0 }
  0x17   :  { %374 = vmatpush3.bf16.msra.mxu1 %v410_v10 }
  0x18   :  { %375 = vmatprep.subr.bf16.mxu1 %v421_v0  ;;  %392 = vmatpush3.bf16.msra.mxu0 %v417_v17 }
  0x19   :  { %393 = vmatprep.subr.bf16.mxu0 %v421_v0 }
  0x1b   :  { %376 = vmatpush3.bf16.msra.mxu1 %v411_v11 }
  0x1c   :  { %377 = vmatprep.subr.bf16.mxu1 %v421_v0  ;;  %394 = vmatpush3.bf16.msra.mxu0 %v418_v18 }
  0x1d   :  { %395 = vmatprep.subr.bf16.mxu0 %v421_v0 }
  0x1f   :  { %378 = vmatpush3.bf16.msra.mxu1 %v412_v12 }
  0x20   :  { %396 = vmatpush3.bf16.msra.mxu0 %v419_v27 }
  0x21   :  { %397 = vmatprep.subr.bf16.mxu0 %v421_v0 }
  0x24   :  { %398 = vmatpush3.bf16.msra.mxu0 %v420_v28 }
  0xc6   :  { %v79_v20 = vpop.f32.mrf.mxu0 }
  0xc7   :  { %v80_v21 = vadd.f32 %v317_v19, %v79_v20 }
  0xc8   :  { %v361_v22 = vpop.f32.mrf.mxu0 }
  0xc9   :  { %v85_v23 = vmax.f32 %v80_v21, 0.0 }
  0xca   :  { %v82_v24 = vpop.f32.mrf.mxu0 }
  0xcb   :  { %v86_v25 = vpack.c.bf16 %v85_v23, %v85_v23 }
  0xcc   :  { %v362_v26 = vpop.f32.mrf.mxu0 }
  0xcd   :  { %380 = vmatmul.mubr.bf16.vlgmr.msra.gmra.mxu1 %v86_v25 }
 0x18d   :  { %v192_v30 = vpop.f32.mrf.mxu1 }
 0x18e   :  { %v193_v31 = vadd.f32 %v319_v29, %v192_v30 }
 0x18f   :  { %v381_v32 = vpop.f32.mrf.mxu1 }
 0x190   :  { %v198_v33 = vmax.f32 %v193_v31, 0.0 }
 0x191   :  { %v195_v34 = vpop.f32.mrf.mxu1 }
 0x192   :  { %v199_v35 = vpack.c.bf16 %v198_v33, %v198_v33 }
 0x193   :  { %v382_v36 = vpop.f32.mrf.mxu1 }
 0x194   :  { %400 = vmatmul.mubr.bf16.vlgmr.msra.gmra.mxu0 %v199_v35 }
 0x254   :  { %v305_v38 = vpop.f32.mrf.mxu0 }
 0x255   :  { %v306_v39 = vadd.f32 %v328_v37, %v305_v38 }
 0x256   :  { %v401_v40 = vpop.f32.mrf.mxu0 }
 0x257   :  { %312 = vst.msk [vmem:[%s559_s7] sm:$0xff] %vm311_vm3, %v306_v39 }
 0x258   :  { %v308_v41 = vpop.f32.mrf.mxu0 }
 0x25a   :  { %v402_v42 = vpop.f32.mrf.mxu0 }

</bundles_post_ra>
